<compile_context>
chip_gen: v7x
topology: tpu7x:2x2x1
jax: 0.10.0
libtpu: 0.0.40
codegen_flags: <defaults>
</compile_context>

<pallas_src>
import functools

import jax
import jax.numpy as jnp
from jax.experimental import pallas as pl
from jax.experimental.pallas import tpu as pltpu

_LANE = 128
_SUB = 8
_MAX_BLOCK_ROWS = 4096   # 4096 rows * 128 lanes * 4 B = 2 MiB per f32 input tile


def _round_up(a, b):
    return ((a + b - 1) // b) * b


def _adaptive_dice_kernel(x_ref, t_ref, m_ref, out_ref, acc_ref, *,
                          n_valid, block_rows, blocks_per_part, alpha,
                          with_logits):
    c = pl.program_id(0)          # partition id ("parallel", v7x megacore)
    i = pl.program_id(1)          # block id within the partition ("arbitrary")

    @pl.when(i == 0)
    def _init():
        acc_ref[...] = jnp.zeros_like(acc_ref)

    x = x_ref[...].astype(jnp.float32)
    t = t_ref[...].astype(jnp.float32)

    if with_logits and (m_ref is None):
        # Fast path: w*p = (1-sigmoid(x))**alpha * sigmoid(x)
        #                = exp(-alpha*x - (1+alpha)*log(1+exp(-x)))
        # No divide / reciprocal / pow; EUP-only transcendentals.
        e = jnp.exp(-x)
        log1pe = jnp.log(1.0 + e)
        wp = jnp.exp((-alpha) * x - (1.0 + alpha) * log1pe)
    else:
        if with_logits:
            e = jnp.exp(-x)
            p = jnp.exp(-jnp.log(1.0 + e))          # sigmoid(x) without a divide
        else:
            p = x
        if m_ref is not None:
            m = m_ref[...].astype(jnp.float32)
            p = p * m
            t = t * m
        one_minus = 1.0 - p
        # (1-p)**alpha: the 1e-30 clamp only matters for 0 < 1-p < 1e-30 (below
        # f32 resolution); the trailing multiply keeps exact 0**alpha == 0 as in
        # torch.  Negative bases (invalid inputs when with_logits=False) give 0
        # here instead of torch's NaN.
        w = jnp.exp(alpha * jnp.log(jnp.maximum(one_minus, 1e-30)))
        w = w * (one_minus > 0.0).astype(jnp.float32)
        wp = w * p

    wpt = wp * t

    folds = block_rows // _SUB

    def _fold(v):
        # Pure VPU sublane-strided adds; the cross-lane reduce happens outside.
        return v.reshape(folds, _SUB, _LANE).sum(axis=0)

    # Edge detection at row granularity (no int32 overflow for huge tensors).
    # A block needs masking iff it covers any flat index >= n_valid; this is
    # also true for clamped duplicate blocks (their row0 is past the data).
    logical_block = c * blocks_per_part + i
    n_full_rows = n_valid // _LANE      # rows that are entirely valid
    rem = n_valid % _LANE               # valid lanes in the single partial row
    is_interior = (logical_block + 1) * block_rows <= n_full_rows

    @pl.when(is_interior)
    def _acc_interior():
        acc_ref[0] += _fold(wpt)        # sum w*p*t
        acc_ref[1] += _fold(wp)         # sum w*p
        acc_ref[2] += _fold(t)          # sum t

    @pl.when(jnp.logical_not(is_interior))
    def _acc_edge():
        row0 = logical_block * block_rows
        row_ids = row0 + jax.lax.broadcasted_iota(
            jnp.int32, (block_rows, _LANE), 0)
        valid = row_ids < n_full_rows
        if rem:
            col_ids = jax.lax.broadcasted_iota(
                jnp.int32, (block_rows, _LANE), 1)
            valid = valid | ((row_ids == n_full_rows) & (col_ids < rem))
        # where() is a select, so garbage (even NaN/Inf) in the ragged region
        # of the input window never reaches the accumulator.
        acc_ref[0] += _fold(jnp.where(valid, wpt, 0.0))
        acc_ref[1] += _fold(jnp.where(valid, wp, 0.0))
        acc_ref[2] += _fold(jnp.where(valid, t, 0.0))

    @pl.when(i == pl.num_programs(1) - 1)
    def _flush():
        out_ref[...] = acc_ref[...].reshape(out_ref.shape)


def adaptive_dice_loss(x, target, mask=None, *, alpha=0.1, smooth=1e-8,
                       square_denominator=False, with_logits=True,
                       reduction="mean"):
    """AdaptiveDiceLoss.forward as a Pallas TPU streaming reduction.

    square_denominator / reduction are accepted for API parity but (exactly as
    in the PyTorch module) unused by forward.  Operands are streamed in their
    native dtype -- keep logits/targets/masks narrow (e.g. bf16) from the
    producer on bandwidth-bound chips; accumulation is always f32.
    """
    del square_denominator, reduction

    n = x.size
    flat_x = x.reshape(-1)
    flat_t = target.reshape(-1)
    flat_m = None if mask is None else mask.reshape(-1)

    # Lane-align only when needed (rare); the padded tail is excluded by the
    # in-kernel edge mask anyway.
    n_lane = _round_up(n, _LANE)
    if n_lane != n:
        pad = n_lane - n
        flat_x = jnp.pad(flat_x, (0, pad))
        flat_t = jnp.pad(flat_t, (0, pad))
        if flat_m is not None:
            flat_m = jnp.pad(flat_m, (0, pad))
    rows = n_lane // _LANE

    # Block sizing: as large as useful (<= 2 MiB per f32 tile) and rebalanced
    # so the last block is not a sliver.  Multiple of 16 keeps bf16 inputs
    # tile-aligned; the in-kernel (folds, 8, 128) fold needs a multiple of 8.
    if rows <= _MAX_BLOCK_ROWS:
        block_rows = _round_up(rows, 16)
        n_blocks = 1
    else:
        n_blocks = pl.cdiv(rows, _MAX_BLOCK_ROWS)
        if n_blocks % 2:
            n_blocks += 1                       # prefer even count for 2-way split
        block_rows = _round_up(pl.cdiv(rows, n_blocks), 16)
        n_blocks = pl.cdiv(rows, block_rows)

    # Only split over the leading "parallel" axis (v7x megacore) when there are
    # >= 2 blocks: small inputs must not be read / computed twice on 1-TC chips.
    num_parts = 2 if n_blocks >= 2 else 1
    blocks_per_part = pl.cdiv(n_blocks, num_parts)
    grid = (num_parts, blocks_per_part)

    def idx_map(c, i):
        # Clamp: a partition with no real work left re-reads the last block;
        # the in-kernel edge path zeroes its contribution.
        return (jnp.minimum(c * blocks_per_part + i, n_blocks - 1), 0)

    operands = [flat_x.reshape(rows, _LANE), flat_t.reshape(rows, _LANE)]
    in_specs = [pl.BlockSpec((block_rows, _LANE), idx_map),
                pl.BlockSpec((block_rows, _LANE), idx_map)]
    if flat_m is not None:
        operands.append(flat_m.reshape(rows, _LANE))
        in_specs.append(pl.BlockSpec((block_rows, _LANE), idx_map))

    kernel_impl = functools.partial(
        _adaptive_dice_kernel,
        n_valid=n, block_rows=block_rows, blocks_per_part=blocks_per_part,
        alpha=float(alpha), with_logits=with_logits)
    if flat_m is None:
        kernel = lambda x_ref, t_ref, out_ref, acc_ref: kernel_impl(
            x_ref, t_ref, None, out_ref, acc_ref)
    else:
        kernel = kernel_impl

    partials = pl.pallas_call(
        kernel,
        out_shape=jax.ShapeDtypeStruct((num_parts, 3, _SUB, _LANE), jnp.float32),
        grid_spec=pltpu.PrefetchScalarGridSpec(
            num_scalar_prefetch=0,
            grid=grid,
            in_specs=in_specs,
            out_specs=pl.BlockSpec((1, 3, _SUB, _LANE),
                                   lambda c, i: (c, 0, 0, 0)),
            scratch_shapes=[pltpu.VMEM((3, _SUB, _LANE), jnp.float32)],
        ),
        compiler_params=pltpu.CompilerParams(
            dimension_semantics=("parallel", "arbitrary"),
            # 4096-row f32 tiles, double-buffered, 3 inputs -> ~12 MiB: well
            # under the 32 MiB scoped default (and v7x's 64 MiB physical).
            vmem_limit_bytes=32 * 1024 * 1024),
    )(*operands)

    sums = partials.sum(axis=(0, 2, 3))      # (3,) = [sum w*p*t, sum w*p, sum t]
    intersection = sums[0] + smooth
    denominator = sums[1] + sums[2] + smooth
    return 1.0 - 2.0 * intersection / denominator


def _adaptive_dice_loss_ref(x, target, mask=None, *, alpha=0.1, smooth=1e-8,
                            with_logits=True):
    fi = x.reshape(-1).astype(jnp.float32)
    ft = target.reshape(-1).astype(jnp.float32)
    if with_logits:
        fi = jax.nn.sigmoid(fi)
    if mask is not None:
        m = mask.reshape(-1).astype(jnp.float32)
        fi = fi * m
        ft = ft * m
    w = jnp.power(1.0 - fi, alpha)
    intersection = jnp.sum(w * fi * ft) + smooth
    denominator = jnp.sum(w * fi) + jnp.sum(ft) + smooth
    return 1.0 - 2.0 * intersection / denominator


if __name__ == "__main__":
    key = jax.random.PRNGKey(0)
    k1, k2, k3 = jax.random.split(key, 3)

    # Small NCHW shapes consistent with a segmentation-style use of the loss.
    x = jax.random.normal(k1, (2, 4, 16, 16), dtype=jnp.float32)            # logits
    target = (jax.random.uniform(k2, (2, 4, 16, 16)) > 0.5).astype(jnp.float32)
    mask = (jax.random.uniform(k3, (2, 4, 16, 16)) > 0.2).astype(jnp.float32)

    # 1) Default path (with_logits=True, no mask) -> divide/pow-free fast path.
    out = adaptive_dice_loss(x, target)
    jax.block_until_ready(out)
    ref = _adaptive_dice_loss_ref(x, target)
    assert jnp.allclose(out, ref, atol=1e-5, rtol=1e-5), (out, ref)

    # 2) With an explicit mask (generic path).
    out2 = adaptive_dice_loss(x, target, mask)
    jax.block_until_ready(out2)
    ref2 = _adaptive_dice_loss_ref(x, target, mask)
    assert jnp.allclose(out2, ref2, atol=1e-5, rtol=1e-5), (out2, ref2)

    # 3) bf16 logits stay bf16 on the wire and are cast to f32 inside the kernel.
    x_bf16 = x.astype(jnp.bfloat16)
    out3 = adaptive_dice_loss(x_bf16, target)
    jax.block_until_ready(out3)
    ref3 = _adaptive_dice_loss_ref(x_bf16, target)
    assert jnp.allclose(out3, ref3, atol=1e-4, rtol=1e-4), (out3, ref3)

    # 4) Non-lane-aligned size: exercises the gated edge-block / tail-mask path.
    k4, k5 = jax.random.split(k1)
    xs = jax.random.normal(k4, (3, 5, 11), dtype=jnp.float32)
    ts = (jax.random.uniform(k5, (3, 5, 11)) > 0.5).astype(jnp.float32)
    out4 = adaptive_dice_loss(xs, ts)
    jax.block_until_ready(out4)
    ref4 = _adaptive_dice_loss_ref(xs, ts)
    assert jnp.allclose(out4, ref4, atol=1e-5, rtol=1e-5), (out4, ref4)

    print("KERNEL_OK")
</pallas_src>

<mosaic_0001>
module attributes {stable_mosaic.version = 11 : i64} {
  func.func @_lambda_(%arg0: i32, %arg1: i32, %arg2: memref<16x128xf32, #tpu.memory_space<vmem>>, %arg3: memref<16x128xf32, #tpu.memory_space<vmem>>, %arg4: memref<1x3x8x128xf32, #tpu.memory_space<vmem>>, %arg5: memref<3x8x128xf32, #tpu.memory_space<vmem>>) attributes {dimension_semantics = [#tpu.dimension_semantics<parallel>, #tpu.dimension_semantics<arbitrary>], iteration_bounds = array<i64: 1, 1>, scalar_prefetch = 0 : i64, scratch_operands = 1 : i64, tpu.core_type = #tpu.core_type<tc>, window_params = [{transform_indices = @transform_0, window_bounds = array<i64: 16, 128>}, {transform_indices = @transform_1, window_bounds = array<i64: 16, 128>}, {transform_indices = @transform_2, window_bounds = array<i64: 1, 3, 8, 128>}]} {
    %c0_i32 = arith.constant 0 : i32
    %0 = arith.cmpi eq, %arg1, %c0_i32 : i32
    %1 = arith.extui %0 : i1 to i32
    %c0_i32_0 = arith.constant 0 : i32
    %2 = arith.cmpi ne, %1, %c0_i32_0 : i32
    scf.if %2 {
      %cst_13 = arith.constant 0.000000e+00 : f32
      %31 = vector.broadcast %cst_13 : f32 to vector<3x8x128xf32>
      %c0_14 = arith.constant 0 : index
      %c0_15 = arith.constant 0 : index
      %c0_16 = arith.constant 0 : index
      %32 = vector.load %arg5[%c0_14, %c0_15, %c0_16] : memref<3x8x128xf32, #tpu.memory_space<vmem>>, vector<3x8x128xf32>
      tpu.vector_store %arg5[%c0_14, %c0_15, %c0_16], %31 {strides = array<i32>} : memref<3x8x128xf32, #tpu.memory_space<vmem>>, vector<3x8x128xf32>,
    } else {
    }
    %c0 = arith.constant 0 : index
    %c0_1 = arith.constant 0 : index
    %3 = vector.load %arg2[%c0, %c0_1] : memref<16x128xf32, #tpu.memory_space<vmem>>, vector<16x128xf32>
    %c0_2 = arith.constant 0 : index
    %c0_3 = arith.constant 0 : index
    %4 = vector.load %arg3[%c0_2, %c0_3] : memref<16x128xf32, #tpu.memory_space<vmem>>, vector<16x128xf32>
    %cst = arith.constant 0.000000e+00 : f32
    %5 = vector.broadcast %cst : f32 to vector<16x128xf32>
    %6 = arith.subf %5, %3 : vector<16x128xf32>
    %7 = math.exp %6 : vector<16x128xf32>
    %cst_4 = arith.constant 1.000000e+00 : f32
    %8 = vector.broadcast %cst_4 : f32 to vector<16x128xf32>
    %9 = arith.addf %8, %7 : vector<16x128xf32>
    %10 = math.log %9 : vector<16x128xf32>
    %cst_5 = arith.constant -1.000000e-01 : f32
    %11 = vector.broadcast %cst_5 : f32 to vector<16x128xf32>
    %12 = arith.mulf %11, %3 : vector<16x128xf32>
    %cst_6 = arith.constant 1.100000e+00 : f32
    %13 = vector.broadcast %cst_6 : f32 to vector<16x128xf32>
    %14 = arith.mulf %13, %10 : vector<16x128xf32>
    %15 = arith.subf %12, %14 : vector<16x128xf32>
    %16 = math.exp %15 : vector<16x128xf32>
    %17 = arith.mulf %16, %4 : vector<16x128xf32>
    %c1_i32 = arith.constant 1 : i32
    %18 = arith.muli %arg0, %c1_i32 : i32
    %19 = arith.addi %18, %arg1 : i32
    %c1_i32_7 = arith.constant 1 : i32
    %20 = arith.addi %19, %c1_i32_7 : i32
    %c16_i32 = arith.constant 16 : i32
    %21 = arith.muli %20, %c16_i32 : i32
    %c16_i32_8 = arith.constant 16 : i32
    %22 = arith.cmpi sle, %21, %c16_i32_8 : i32
    %23 = arith.extui %22 : i1 to i32
    %c0_i32_9 = arith.constant 0 : i32
    %24 = arith.cmpi ne, %23, %c0_i32_9 : i32
    scf.if %24 {
      %c0_13 = arith.constant 0 : index
      %c0_14 = arith.constant 0 : index
      %c0_15 = arith.constant 0 : index
      %31 = vector.load %arg5[%c0_13, %c0_14, %c0_15] : memref<3x8x128xf32, #tpu.memory_space<vmem>>, vector<1x8x128xf32>
      %32 = vector.shape_cast %31 : vector<1x8x128xf32> to vector<8x128xf32>
      %33 = vector.shape_cast %17 : vector<16x128xf32> to vector<2x8x128xf32>
      %cst_16 = arith.constant dense<0.000000e+00> : vector<8x128xf32>
      %34 = vector.multi_reduction <add>, %33, %cst_16 [0] : vector<2x8x128xf32> to vector<8x128xf32>
      %35 = arith.addf %32, %34 : vector<8x128xf32>
      %c0_17 = arith.constant 0 : index
      %c0_18 = arith.constant 0 : index
      %c0_19 = arith.constant 0 : index
      %36 = vector.load %arg5[%c0_17, %c0_18, %c0_19] : memref<3x8x128xf32, #tpu.memory_space<vmem>>, vector<1x8x128xf32>
      %37 = vector.shape_cast %36 : vector<1x8x128xf32> to vector<8x128xf32>
      %38 = vector.shape_cast %35 : vector<8x128xf32> to vector<1x8x128xf32>
      tpu.vector_store %arg5[%c0_17, %c0_18, %c0_19], %38 {strides = array<i32>} : memref<3x8x128xf32, #tpu.memory_space<vmem>>, vector<1x8x128xf32>,
      %c1 = arith.constant 1 : index
      %c0_20 = arith.constant 0 : index
      %c0_21 = arith.constant 0 : index
      %39 = vector.load %arg5[%c1, %c0_20, %c0_21] : memref<3x8x128xf32, #tpu.memory_space<vmem>>, vector<1x8x128xf32>
      %40 = vector.shape_cast %39 : vector<1x8x128xf32> to vector<8x128xf32>
      %41 = vector.shape_cast %16 : vector<16x128xf32> to vector<2x8x128xf32>
      %cst_22 = arith.constant dense<0.000000e+00> : vector<8x128xf32>
      %42 = vector.multi_reduction <add>, %41, %cst_22 [0] : vector<2x8x128xf32> to vector<8x128xf32>
      %43 = arith.addf %40, %42 : vector<8x128xf32>
      %c1_23 = arith.constant 1 : index
      %c0_24 = arith.constant 0 : index
      %c0_25 = arith.constant 0 : index
      %44 = vector.load %arg5[%c1_23, %c0_24, %c0_25] : memref<3x8x128xf32, #tpu.memory_space<vmem>>, vector<1x8x128xf32>
      %45 = vector.shape_cast %44 : vector<1x8x128xf32> to vector<8x128xf32>
      %46 = vector.shape_cast %43 : vector<8x128xf32> to vector<1x8x128xf32>
      tpu.vector_store %arg5[%c1_23, %c0_24, %c0_25], %46 {strides = array<i32>} : memref<3x8x128xf32, #tpu.memory_space<vmem>>, vector<1x8x128xf32>,
      %c2 = arith.constant 2 : index
      %c0_26 = arith.constant 0 : index
      %c0_27 = arith.constant 0 : index
      %47 = vector.load %arg5[%c2, %c0_26, %c0_27] : memref<3x8x128xf32, #tpu.memory_space<vmem>>, vector<1x8x128xf32>
      %48 = vector.shape_cast %47 : vector<1x8x128xf32> to vector<8x128xf32>
      %49 = vector.shape_cast %4 : vector<16x128xf32> to vector<2x8x128xf32>
      %cst_28 = arith.constant dense<0.000000e+00> : vector<8x128xf32>
      %50 = vector.multi_reduction <add>, %49, %cst_28 [0] : vector<2x8x128xf32> to vector<8x128xf32>
      %51 = arith.addf %48, %50 : vector<8x128xf32>
      %c2_29 = arith.constant 2 : index
      %c0_30 = arith.constant 0 : index
      %c0_31 = arith.constant 0 : index
      %52 = vector.load %arg5[%c2_29, %c0_30, %c0_31] : memref<3x8x128xf32, #tpu.memory_space<vmem>>, vector<1x8x128xf32>
      %53 = vector.shape_cast %52 : vector<1x8x128xf32> to vector<8x128xf32>
      %54 = vector.shape_cast %51 : vector<8x128xf32> to vector<1x8x128xf32>
      tpu.vector_store %arg5[%c2_29, %c0_30, %c0_31], %54 {strides = array<i32>} : memref<3x8x128xf32, #tpu.memory_space<vmem>>, vector<1x8x128xf32>,
    } else {
    }
    %true = arith.constant true
    %25 = arith.xori %22, %true : i1
    %26 = arith.extui %25 : i1 to i32
    %c0_i32_10 = arith.constant 0 : i32
    %27 = arith.cmpi ne, %26, %c0_i32_10 : i32
    scf.if %27 {
      %c16_i32_13 = arith.constant 16 : i32
      %31 = arith.muli %19, %c16_i32_13 : i32
      %32 = tpu.iota {dimensions = array<i32: 0>} : vector<16x128xi32>
      %33 = vector.broadcast %31 : i32 to vector<16x128xi32>
      %34 = arith.addi %33, %32 : vector<16x128xi32>
      %c16_i32_14 = arith.constant 16 : i32
      %35 = vector.broadcast %c16_i32_14 : i32 to vector<16x128xi32>
      %36 = arith.cmpi slt, %34, %35 : vector<16x128xi32>
      %c0_15 = arith.constant 0 : index
      %c0_16 = arith.constant 0 : index
      %c0_17 = arith.constant 0 : index
      %37 = vector.load %arg5[%c0_15, %c0_16, %c0_17] : memref<3x8x128xf32, #tpu.memory_space<vmem>>, vector<1x8x128xf32>
      %38 = vector.shape_cast %37 : vector<1x8x128xf32> to vector<8x128xf32>
      %cst_18 = arith.constant 0.000000e+00 : f32
      %39 = vector.broadcast %cst_18 : f32 to vector<16x128xf32>
      %40 = arith.select %36, %17, %39 : vector<16x128xi1>, vector<16x128xf32>
      %41 = vector.shape_cast %40 : vector<16x128xf32> to vector<2x8x128xf32>
      %cst_19 = arith.constant dense<0.000000e+00> : vector<8x128xf32>
      %42 = vector.multi_reduction <add>, %41, %cst_19 [0] : vector<2x8x128xf32> to vector<8x128xf32>
      %43 = arith.addf %38, %42 : vector<8x128xf32>
      %c0_20 = arith.constant 0 : index
      %c0_21 = arith.constant 0 : index
      %c0_22 = arith.constant 0 : index
      %44 = vector.load %arg5[%c0_20, %c0_21, %c0_22] : memref<3x8x128xf32, #tpu.memory_space<vmem>>, vector<1x8x128xf32>
      %45 = vector.shape_cast %44 : vector<1x8x128xf32> to vector<8x128xf32>
      %46 = vector.shape_cast %43 : vector<8x128xf32> to vector<1x8x128xf32>
      tpu.vector_store %arg5[%c0_20, %c0_21, %c0_22], %46 {strides = array<i32>} : memref<3x8x128xf32, #tpu.memory_space<vmem>>, vector<1x8x128xf32>,
      %c1 = arith.constant 1 : index
      %c0_23 = arith.constant 0 : index
      %c0_24 = arith.constant 0 : index
      %47 = vector.load %arg5[%c1, %c0_23, %c0_24] : memref<3x8x128xf32, #tpu.memory_space<vmem>>, vector<1x8x128xf32>
      %48 = vector.shape_cast %47 : vector<1x8x128xf32> to vector<8x128xf32>
      %cst_25 = arith.constant 0.000000e+00 : f32
      %49 = vector.broadcast %cst_25 : f32 to vector<16x128xf32>
      %50 = arith.select %36, %16, %49 : vector<16x128xi1>, vector<16x128xf32>
      %51 = vector.shape_cast %50 : vector<16x128xf32> to vector<2x8x128xf32>
      %cst_26 = arith.constant dense<0.000000e+00> : vector<8x128xf32>
      %52 = vector.multi_reduction <add>, %51, %cst_26 [0] : vector<2x8x128xf32> to vector<8x128xf32>
      %53 = arith.addf %48, %52 : vector<8x128xf32>
      %c1_27 = arith.constant 1 : index
      %c0_28 = arith.constant 0 : index
      %c0_29 = arith.constant 0 : index
      %54 = vector.load %arg5[%c1_27, %c0_28, %c0_29] : memref<3x8x128xf32, #tpu.memory_space<vmem>>, vector<1x8x128xf32>
      %55 = vector.shape_cast %54 : vector<1x8x128xf32> to vector<8x128xf32>
      %56 = vector.shape_cast %53 : vector<8x128xf32> to vector<1x8x128xf32>
      tpu.vector_store %arg5[%c1_27, %c0_28, %c0_29], %56 {strides = array<i32>} : memref<3x8x128xf32, #tpu.memory_space<vmem>>, vector<1x8x128xf32>,
      %c2 = arith.constant 2 : index
      %c0_30 = arith.constant 0 : index
      %c0_31 = arith.constant 0 : index
      %57 = vector.load %arg5[%c2, %c0_30, %c0_31] : memref<3x8x128xf32, #tpu.memory_space<vmem>>, vector<1x8x128xf32>
      %58 = vector.shape_cast %57 : vector<1x8x128xf32> to vector<8x128xf32>
      %cst_32 = arith.constant 0.000000e+00 : f32
      %59 = vector.broadcast %cst_32 : f32 to vector<16x128xf32>
      %60 = arith.select %36, %4, %59 : vector<16x128xi1>, vector<16x128xf32>
      %61 = vector.shape_cast %60 : vector<16x128xf32> to vector<2x8x128xf32>
      %cst_33 = arith.constant dense<0.000000e+00> : vector<8x128xf32>
      %62 = vector.multi_reduction <add>, %61, %cst_33 [0] : vector<2x8x128xf32> to vector<8x128xf32>
      %63 = arith.addf %58, %62 : vector<8x128xf32>
      %c2_34 = arith.constant 2 : index
      %c0_35 = arith.constant 0 : index
      %c0_36 = arith.constant 0 : index
      %64 = vector.load %arg5[%c2_34, %c0_35, %c0_36] : memref<3x8x128xf32, #tpu.memory_space<vmem>>, vector<1x8x128xf32>
      %65 = vector.shape_cast %64 : vector<1x8x128xf32> to vector<8x128xf32>
      %66 = vector.shape_cast %63 : vector<8x128xf32> to vector<1x8x128xf32>
      tpu.vector_store %arg5[%c2_34, %c0_35, %c0_36], %66 {strides = array<i32>} : memref<3x8x128xf32, #tpu.memory_space<vmem>>, vector<1x8x128xf32>,
    } else {
    }
    %c0_i32_11 = arith.constant 0 : i32
    %28 = arith.cmpi eq, %arg1, %c0_i32_11 : i32
    %29 = arith.extui %28 : i1 to i32
    %c0_i32_12 = arith.constant 0 : i32
    %30 = arith.cmpi ne, %29, %c0_i32_12 : i32
    scf.if %30 {
      %c0_13 = arith.constant 0 : index
      %c0_14 = arith.constant 0 : index
      %c0_15 = arith.constant 0 : index
      %31 = vector.load %arg5[%c0_13, %c0_14, %c0_15] : memref<3x8x128xf32, #tpu.memory_space<vmem>>, vector<3x8x128xf32>
      %32 = vector.shape_cast %31 : vector<3x8x128xf32> to vector<1x3x8x128xf32>
      %c0_16 = arith.constant 0 : index
      %c0_17 = arith.constant 0 : index
      %c0_18 = arith.constant 0 : index
      %c0_19 = arith.constant 0 : index
      %33 = vector.load %arg4[%c0_16, %c0_17, %c0_18, %c0_19] : memref<1x3x8x128xf32, #tpu.memory_space<vmem>>, vector<1x3x8x128xf32>
      tpu.vector_store %arg4[%c0_16, %c0_17, %c0_18, %c0_19], %32 {strides = array<i32>} : memref<1x3x8x128xf32, #tpu.memory_space<vmem>>, vector<1x3x8x128xf32>,
    } else {
    }
    return
  }
  func.func @transform_0(%arg0: i32, %arg1: i32) -> (i32, i32) {
    %c1_i32 = arith.constant 1 : i32
    %0 = arith.muli %arg0, %c1_i32 : i32
    %1 = arith.addi %0, %arg1 : i32
    %c0_i32 = arith.constant 0 : i32
    %2 = arith.minsi %1, %c0_i32 : i32
    %c0_i32_0 = arith.constant 0 : i32
    %c0_i32_1 = arith.constant 0 : i32
    return %2, %c0_i32_0 : i32, i32
  }
  func.func @transform_1(%arg0: i32, %arg1: i32) -> (i32, i32) {
    %c1_i32 = arith.constant 1 : i32
    %0 = arith.muli %arg0, %c1_i32 : i32
    %1 = arith.addi %0, %arg1 : i32
    %c0_i32 = arith.constant 0 : i32
    %2 = arith.minsi %1, %c0_i32 : i32
    %c0_i32_0 = arith.constant 0 : i32
    %c0_i32_1 = arith.constant 0 : i32
    return %2, %c0_i32_0 : i32, i32
  }
  func.func @transform_2(%arg0: i32, %arg1: i32) -> (i32, i32, i32, i32) {
    %c0_i32 = arith.constant 0 : i32
    %c0_i32_0 = arith.constant 0 : i32
    %c0_i32_1 = arith.constant 0 : i32
    %c0_i32_2 = arith.constant 0 : i32
    return %arg0, %c0_i32, %c0_i32_0, %c0_i32_1 : i32, i32, i32, i32
  }
}

</mosaic_0001>

<bundles_post_ra>
// kernel: tpu_custom_call.1
= control target key start
LH: loop header
LB: loop body
LE: loop exit
PB: predicated region body
PF: predicated region fallthrough
CT: control target
= control target key end

     0   :  { %7 = vsyncpa [#allocation4], 0  ;;  %s334_s0 = inlined_call_operand.hbm [shape: f32[16,128], index: 0, kind: input, shape index: {}]   ;;  %s335_s1 = inlined_call_operand.hbm [shape: f32[16,128], index: 1, kind: input, shape index: {}]   ;;  %s336_s2 = inlined_call_operand.hbm [shape: f32[1,3,8,128], index: 2, kind: output, shape index: {}]  }
   0x1   :  { %8 = vsyncpa [#allocation7], 0 }
   0x2   :  { %9 = vsyncpa [#allocation5], 0  ;;  %s269_s9 = smov [#allocation3]   ;;  %s197_s13 = scalar_lea.hbm %s334_s0, 256 }
   0x3   :  { %s21_s10 = sshll.u32 %s269_s9, 4  ;;  %p198_p0 = scmp.ne.s32.totalorder %s334_s0, %s197_s13  ;;  %s22_s10 = int_to_ptr.vmem [resolvable:$true] %s21_s10 }
   0x4   :  { %p201_p1 = scmp.lt.u32.totalorder %s197_s13, %s334_s0 }
   0x6   :  { %p203_p2 = pnand %p201_p1, %p198_p0 }
   0x8   :  { %206 = shalt.err (!%p203_p2)
}
   0x9   :  { %s207_s18 = scalar_lea.vmem %s22_s10, 256  ;;  %p212_p4 = scmp.lt.s32.totalorder %s22_s10, %s22_s10 }
   0xa   :  { %p208_p3 = scmp.ne.s32.totalorder %s22_s10, %s207_s18  ;;  %p213_p5 = scmp.lt.s32.totalorder %s207_s18, %s207_s18 }
   0xc   :  { %p214_p6 = por %p213_p5, %p212_p4 }
   0xe   :  { %p215_p7 = pnand %p214_p6, %p208_p3 }
  0x10   :  { %218 = shalt.err (!%p215_p7)
}
  0x11   :  { %s270_s19 = smov 128   ;;  %s271_s20 = smov 8  }
  0x12   :  { %27 = dma.hbm_to_vmem [thread:$0]  %s334_s0, 256, %s22_s10, [#allocation4], %s270_s19, %s270_s19, %s271_s20  }
  0x13   :  { %s272_s23 = smov [#allocation6]   ;;  %s219_s27 = scalar_lea.hbm %s335_s1, 256 }
  0x14   :  { %s39_s24 = sshll.u32 %s272_s23, 4  ;;  %p220_p8 = scmp.ne.s32.totalorder %s335_s1, %s219_s27  ;;  %s40_s24 = int_to_ptr.vmem [resolvable:$true] %s39_s24 }
  0x15   :  { %p223_p9 = scmp.lt.u32.totalorder %s219_s27, %s335_s1 }
  0x17   :  { %p225_p10 = pnand %p223_p9, %p220_p8 }
  0x19   :  { %228 = shalt.err (!%p225_p10)
}
  0x1a   :  { %s229_s4 = scalar_lea.vmem %s40_s24, 256  ;;  %p234_p12 = scmp.lt.s32.totalorder %s40_s24, %s40_s24 }
  0x1b   :  { %p230_p11 = scmp.ne.s32.totalorder %s40_s24, %s229_s4  ;;  %p235_p13 = scmp.lt.s32.totalorder %s229_s4, %s229_s4 }
  0x1d   :  { %p236_p0 = por %p235_p13, %p234_p12 }
  0x1f   :  { %p237_p1 = pnand %p236_p0, %p230_p11 }
  0x21   :  { %240 = shalt.err (!%p237_p1)
}
  0x22   :  { %45 = dma.hbm_to_vmem [thread:$0]  %s335_s1, 256, %s40_s24, [#allocation7], %s270_s19, %s270_s19, %s271_s20  }
  0x23   :  { %263 = dma.done.wait [#allocation4], 256  }
  0x24   :  { %264 = vsyncadd [#allocation4], 4294967040 }
  0x25   :  { %265 = dma.done.wait [#allocation7], 256  }
  0x26   :  { %266 = vsyncadd [#allocation7], 4294967040  ;;  %v67_v0 = vld [vmem:[#allocation3] sm:$0xff]  ;;  %v68_v1 = vld [vmem:[#allocation3 + $0x8] sm:$0xff]  ;;  %s273_s1 = smov [#allocation8]  }
  0x27   :  { %v69_v2 = vld [vmem:[#allocation6] sm:$0xff]  ;;  %v70_v3 = vld [vmem:[#allocation6 + $0x8] sm:$0xff]  ;;  %v71_v4 = vsub.f32 0.0, %v67_v0  ;;  %v72_v5 = vsub.f32 0.0, %v68_v1  ;;  %v83_v16 = vmul.f32 -0.1, %v67_v0 }
  0x28   :  { %v113_v6 = vadd.f32 %v70_v3, %v69_v2  ;;  %v84_v18 = vmul.f32 -0.1, %v68_v1  ;;  %s163_s6 = sshll.u32 %s273_s1, 4  ;;  %s164_s6 = int_to_ptr.vmem [resolvable:$true] %s163_s6 }
  0x29   :  { %v73_v7 = vmul.f32 1.442695, %v71_v4  ;;  %v75_v8 = vmul.f32 1.442695, %v72_v5  ;;  %s241_s7 = scalar_lea.vmem %s164_s6, 384  ;;  %p246_p3 = scmp.lt.s32.totalorder %s164_s6, %s164_s6 }
  0x2a   :  { %157 = vst [vmem:[#allocation8 + $0x10] sm:$0xff] %v113_v6  ;;  %p242_p2 = scmp.ne.s32.totalorder %s164_s6, %s241_s7  ;;  %p247_p4 = scmp.lt.s32.totalorder %s241_s7, %s241_s7 }
  0x2b   :  { %185 = vpow2.f32 %v73_v7 }
  0x2c   :  { %187 = vpow2.f32 %v75_v8  ;;  %p248_p5 = por %p247_p4, %p246_p3 }
  0x2e   :  { %p249_p6 = pnand %p248_p5, %p242_p2 }
  0x35   :  { %v186_v9 = vpop.eup %185 }
  0x36   :  { %v188_v10 = vpop.eup %187  ;;  %v77_v11 = vadd.f32 1.0, %v186_v9 }
  0x37   :  { %v78_v12 = vadd.f32 1.0, %v188_v10 }
  0x38   :  { %189 = vlog2.f32 %v77_v11 }
  0x39   :  { %191 = vlog2.f32 %v78_v12 }
  0x42   :  { %v190_v13 = vpop.eup %189 }
  0x43   :  { %v192_v14 = vpop.eup %191  ;;  %v80_v15 = vmul.f32 0.6931472, %v190_v13 }
  0x44   :  { %v82_v17 = vmul.f32 0.6931472, %v192_v14 }
  0x45   :  { %v85_v19 = vmul.f32 1.1, %v80_v15 }
  0x46   :  { %v86_v20 = vmul.f32 1.1, %v82_v17 }
  0x47   :  { %v87_v21 = vsub.f32 %v83_v16, %v85_v19 }
  0x48   :  { %v88_v22 = vsub.f32 %v84_v18, %v86_v20 }
  0x49   :  { %v89_v23 = vmul.f32 1.442695, %v87_v21 }
  0x4a   :  { %v91_v24 = vmul.f32 1.442695, %v88_v22 }
  0x4b   :  { %193 = vpow2.f32 %v89_v23 }
  0x4c   :  { %195 = vpow2.f32 %v91_v24 }
  0x55   :  { %v194_v25 = vpop.eup %193 }
  0x56   :  { %v196_v26 = vpop.eup %195  ;;  %v93_v27 = vmul.f32 %v194_v25, %v69_v2 }
  0x57   :  { %v94_v28 = vmul.f32 %v196_v26, %v70_v3  ;;  %v108_v29 = vadd.f32 %v196_v26, %v194_v25 }
  0x59   :  { %v103_v30 = vadd.f32 %v94_v28, %v93_v27  ;;  %156 = vst [vmem:[#allocation8 + $0x8] sm:$0xff] %v108_v29 }
  0x5b   :  { %155 = vst [vmem:[#allocation8] sm:$0xff] %v103_v30 }
  0x5c   :  { %252 = shalt.err (!%p249_p6)
}
  0x5d   :  { %s253_s10 = scalar_lea.hbm %s336_s2, 384 }
  0x5e   :  { %p254_p7 = scmp.ne.s32.totalorder %s336_s2, %s253_s10  ;;  %p257_p8 = scmp.lt.u32.totalorder %s253_s10, %s336_s2 }
  0x60   :  { %p259_p9 = pnand %p257_p8, %p254_p7 }
  0x62   :  { %262 = shalt.err (!%p259_p9)
}
  0x63   :  { %169 = dma.vmem_to_hbm [thread:$0]  %s164_s6, 384, %s336_s2, [#allocation5], %s270_s19, %s270_s19, %s271_s20  }
  0x64   :  { %267 = dma.done.wait [#allocation5], 384  }
  0x65   :  { %268 = vsyncadd [#allocation5], 4294966912 }
  0x66   :  { %173 = vsyncpa [#allocation4], 1 }
  0x67   :  { %174 = vsyncpa [#allocation7], 1 }
  0x68   :  { %175 = vsyncpa [#allocation5], 1 }

</bundles_post_ra>
